<compile_context>
chip_gen: v6e
topology: v6e:2x2x1
jax: 0.10.0
libtpu: 0.0.40
codegen_flags: <defaults>
</compile_context>

<pallas_src>
import functools

import jax
import jax.numpy as jnp
from jax.experimental import pallas as pl
from jax.experimental.pallas import tpu as pltpu

H1 = 64
H2 = 128
LANE = 128


def _round_up(x, m):
    return (x + m - 1) // m * m


def decoder_kernel(z_ref, w1_ref, b1_ref, w2_ref, b2_ref, w3_ref, b3_ref, o_ref):
    # Fused 3-layer MLP for one batch tile. All weights resident in VMEM (constant block index).
    # z arrives f32 and is cast to bf16 in-kernel; dots accumulate in f32 on the MXU.
    z = z_ref[...].astype(jnp.bfloat16)
    h1 = jnp.dot(z, w1_ref[...], preferred_element_type=jnp.float32) + b1_ref[...]
    h1 = jnp.maximum(h1, 0.0)
    h2 = jnp.dot(h1.astype(jnp.bfloat16), w2_ref[...],
                 preferred_element_type=jnp.float32) + b2_ref[...]
    h2 = jnp.maximum(h2, 0.0)
    out = jnp.dot(h2.astype(jnp.bfloat16), w3_ref[...],
                  preferred_element_type=jnp.float32) + b3_ref[...]
    o_ref[...] = out.astype(o_ref.dtype)


def prepare_params(params):
    """One-time weight prep (call once, outside the hot path):
      * hidden dim 64 zero-padded to 128 lanes (w1 cols / b1 / w2 rows) -> lane-dense h1;
        padded h1 columns are exactly 0 and ReLU(0)=0, so the math is unchanged;
      * w3/b3 keep the true output width (no output padding -> no post-kernel slice);
      * weight matrices cast to bf16 (half the HBM footprint, 2x MXU rate); biases stay f32."""
    w1, b1 = params["w1"], params["b1"]   # (latent, 64), (1, 64)
    w2, b2 = params["w2"], params["b2"]   # (64, 128),   (1, 128)
    w3, b3 = params["w3"], params["b3"]   # (128, Dout), (1, Dout)
    h1p = _round_up(w1.shape[1], LANE)
    w1p = jnp.pad(w1, ((0, 0), (0, h1p - w1.shape[1])))
    b1p = jnp.pad(b1, ((0, 0), (0, h1p - b1.shape[1])))
    w2p = jnp.pad(w2, ((0, h1p - w2.shape[0]), (0, 0)))
    return {
        "w1": w1p.astype(jnp.bfloat16), "b1": b1p.astype(jnp.float32),
        "w2": w2p.astype(jnp.bfloat16), "b2": b2.astype(jnp.float32),
        "w3": w3.astype(jnp.bfloat16), "b3": b3.astype(jnp.float32),
    }


@functools.partial(jax.jit, static_argnames=("bm", "out_dtype"))
def decoder_forward(z, prepared, *, bm=512, out_dtype=jnp.float32):
    """z: (B, latent_dim) float32. prepared: output of prepare_params (bf16/padded weights)."""
    B, latent_dim = z.shape
    w1, b1 = prepared["w1"], prepared["b1"]
    w2, b2 = prepared["w2"], prepared["b2"]
    w3, b3 = prepared["w3"], prepared["b3"]
    dout = w3.shape[1]

    # Batch tiling (no pad / no slice of z or out in the wrapper):
    #  * B <= bm: single step, block == full batch (block dim equal to the full array dim is legal).
    #  * B  > bm: <= bm rows per tile, 16-row aligned (bf16 sublane pairs), targeting >= 4 grid
    #    steps so both v7x TCs get work and each can pipeline its output writeback.
    #    The last block may be ragged; Pallas masks the out-of-bounds rows on store.
    if B <= bm:
        bm_eff = B
    else:
        bm_eff = min(bm, _round_up(pl.cdiv(B, 4), 16))
    grid = (pl.cdiv(B, bm_eff),)

    # Constant block index => weights/biases are not re-DMA'd across grid steps.
    full = lambda a: pl.BlockSpec(a.shape, lambda i: (0,) * a.ndim)

    return pl.pallas_call(
        decoder_kernel,
        out_shape=jax.ShapeDtypeStruct((B, dout), out_dtype),
        grid_spec=pltpu.PrefetchScalarGridSpec(
            num_scalar_prefetch=0,
            grid=grid,
            in_specs=[
                pl.BlockSpec((bm_eff, latent_dim), lambda i: (i, 0)),
                full(w1), full(b1),
                full(w2), full(b2),
                full(w3), full(b3),
            ],
            out_specs=pl.BlockSpec((bm_eff, dout), lambda i: (i, 0)),
        ),
        compiler_params=pltpu.CompilerParams(
            # Batch axis is embarrassingly parallel -> shards across both TCs on v7x.
            dimension_semantics=("parallel",),
        ),
    )(z, w1, b1, w2, b2, w3, b3)


def init_params(key, latent_dim, input_dim, dtype=jnp.float32):
    """Deterministic synthetic init (PyTorch-Linear-like uniform). Weights stored as (in, out)."""
    ks = jax.random.split(key, 6)

    def lin(kw, kb, fan_in, fan_out):
        bound = 1.0 / jnp.sqrt(fan_in)
        w = jax.random.uniform(kw, (fan_in, fan_out), dtype, -bound, bound)
        b = jax.random.uniform(kb, (1, fan_out), dtype, -bound, bound)
        return w, b

    w1, b1 = lin(ks[0], ks[1], latent_dim, H1)
    w2, b2 = lin(ks[2], ks[3], H1, H2)
    w3, b3 = lin(ks[4], ks[5], H2, input_dim)
    return {"w1": w1, "b1": b1, "w2": w2, "b2": b2, "w3": w3, "b3": b3}


def decoder_reference(z, p, emulate_bf16=True):
    if emulate_bf16:
        bf = lambda a: a.astype(jnp.bfloat16)
        h1 = jnp.maximum(jnp.dot(bf(z), bf(p["w1"]),
                                 preferred_element_type=jnp.float32) + p["b1"], 0.0)
        h2 = jnp.maximum(jnp.dot(bf(h1), bf(p["w2"]),
                                 preferred_element_type=jnp.float32) + p["b2"], 0.0)
        return jnp.dot(bf(h2), bf(p["w3"]),
                       preferred_element_type=jnp.float32) + p["b3"]
    h1 = jnp.maximum(z @ p["w1"] + p["b1"], 0.0)
    h2 = jnp.maximum(h1 @ p["w2"] + p["b2"], 0.0)
    return h2 @ p["w3"] + p["b3"]


if __name__ == "__main__":
    key = jax.random.PRNGKey(0)
    k_z, k_p, k_z2 = jax.random.split(key, 3)

    latent_dim = 32
    input_dim = 100   # deliberately not a multiple of 128: exercises the ragged-lane output store
    params = init_params(k_p, latent_dim, input_dim)
    prepared = prepare_params(params)   # hoisted: one-time pad/cast, reused across calls

    # Small batch (B=5): single grid step, block == full array (no batch pad, no slice).
    z_small = jax.random.normal(k_z, (5, latent_dim), jnp.float32)
    out_small = jax.block_until_ready(decoder_forward(z_small, prepared))
    ref_small = decoder_reference(z_small, params)
    assert out_small.shape == (5, input_dim)
    assert jnp.allclose(out_small, ref_small, atol=2e-3, rtol=2e-3), "small-batch mismatch"

    # Larger, awkward batch (B=600): multi-step grid (>=4 steps) with a ragged last tile.
    z_big = jax.random.normal(k_z2, (600, latent_dim), jnp.float32)
    out_big = jax.block_until_ready(decoder_forward(z_big, prepared))
    ref_big = decoder_reference(z_big, params)
    assert out_big.shape == (600, input_dim)
    assert jnp.allclose(out_big, ref_big, atol=2e-3, rtol=2e-3), "big-batch mismatch"

    # Loose sanity check against the full-f32 reference (bf16 matmuls => ~1e-3 rel error).
    ref_f32 = decoder_reference(z_big, params, emulate_bf16=False)
    assert jnp.allclose(out_big, ref_f32, atol=5e-2, rtol=5e-2), "f32 sanity mismatch"

    # TODO(synk): if the downstream consumer tolerates bf16, pass out_dtype=jnp.bfloat16 to halve
    # the dominant output HBM traffic.
    print("KERNEL_OK")
</pallas_src>

<mosaic_0001>
module attributes {stable_mosaic.version = 11 : i64} {
  func.func @decoder_kernel(%arg0: i32, %arg1: memref<5x32xf32, #tpu.memory_space<vmem>>, %arg2: memref<32x128xbf16, #tpu.memory_space<vmem>>, %arg3: memref<1x128xf32, #tpu.memory_space<vmem>>, %arg4: memref<128x128xbf16, #tpu.memory_space<vmem>>, %arg5: memref<1x128xf32, #tpu.memory_space<vmem>>, %arg6: memref<128x100xbf16, #tpu.memory_space<vmem>>, %arg7: memref<1x100xf32, #tpu.memory_space<vmem>>, %arg8: memref<5x100xf32, #tpu.memory_space<vmem>>) attributes {dimension_semantics = [#tpu.dimension_semantics<parallel>], iteration_bounds = array<i64: 1>, scalar_prefetch = 0 : i64, scratch_operands = 0 : i64, tpu.core_type = #tpu.core_type<tc>, window_params = [{transform_indices = @transform_0, window_bounds = array<i64: 5, 32>}, {pipeline_mode = #tpu.pipeline_mode<synchronous>, transform_indices = @transform_1, window_bounds = array<i64: 32, 128>}, {pipeline_mode = #tpu.pipeline_mode<synchronous>, transform_indices = @transform_2, window_bounds = array<i64: 1, 128>}, {pipeline_mode = #tpu.pipeline_mode<synchronous>, transform_indices = @transform_3, window_bounds = array<i64: 128, 128>}, {pipeline_mode = #tpu.pipeline_mode<synchronous>, transform_indices = @transform_4, window_bounds = array<i64: 1, 128>}, {pipeline_mode = #tpu.pipeline_mode<synchronous>, transform_indices = @transform_5, window_bounds = array<i64: 128, 100>}, {pipeline_mode = #tpu.pipeline_mode<synchronous>, transform_indices = @transform_6, window_bounds = array<i64: 1, 100>}, {transform_indices = @transform_7, window_bounds = array<i64: 5, 100>}]} {
    %c0 = arith.constant 0 : index
    %c0_0 = arith.constant 0 : index
    %0 = vector.load %arg1[%c0, %c0_0] : memref<5x32xf32, #tpu.memory_space<vmem>>, vector<5x32xf32>
    %1 = arith.truncf %0 : vector<5x32xf32> to vector<5x32xbf16>
    %c0_1 = arith.constant 0 : index
    %c0_2 = arith.constant 0 : index
    %2 = vector.load %arg2[%c0_1, %c0_2] : memref<32x128xbf16, #tpu.memory_space<vmem>>, vector<32x128xbf16>
    %cst = arith.constant dense<0.000000e+00> : vector<5x128xf32>
    %3 = tpu.matmul %1, %2, %cst {dimension_numbers = #tpu.dot_dimension_numbers<[1], [0], [0], [1], [0, 0, 1, 1], [], []>} : vector<5x32xbf16>, vector<32x128xbf16>, vector<5x128xf32> -> vector<5x128xf32>
    %c0_3 = arith.constant 0 : index
    %c0_4 = arith.constant 0 : index
    %4 = vector.load %arg3[%c0_3, %c0_4] : memref<1x128xf32, #tpu.memory_space<vmem>>, vector<1x128xf32>
    %5 = vector.broadcast %4 : vector<1x128xf32> to vector<5x128xf32>
    %6 = arith.addf %3, %5 : vector<5x128xf32>
    %cst_5 = arith.constant 0.000000e+00 : f32
    %7 = vector.broadcast %cst_5 : f32 to vector<5x128xf32>
    %8 = arith.maximumf %6, %7 : vector<5x128xf32>
    %9 = arith.truncf %8 : vector<5x128xf32> to vector<5x128xbf16>
    %c0_6 = arith.constant 0 : index
    %c0_7 = arith.constant 0 : index
    %10 = vector.load %arg4[%c0_6, %c0_7] : memref<128x128xbf16, #tpu.memory_space<vmem>>, vector<128x128xbf16>
    %cst_8 = arith.constant dense<0.000000e+00> : vector<5x128xf32>
    %11 = tpu.matmul %9, %10, %cst_8 {dimension_numbers = #tpu.dot_dimension_numbers<[1], [0], [0], [1], [0, 0, 1, 1], [], []>} : vector<5x128xbf16>, vector<128x128xbf16>, vector<5x128xf32> -> vector<5x128xf32>
    %c0_9 = arith.constant 0 : index
    %c0_10 = arith.constant 0 : index
    %12 = vector.load %arg5[%c0_9, %c0_10] : memref<1x128xf32, #tpu.memory_space<vmem>>, vector<1x128xf32>
    %13 = vector.broadcast %12 : vector<1x128xf32> to vector<5x128xf32>
    %14 = arith.addf %11, %13 : vector<5x128xf32>
    %cst_11 = arith.constant 0.000000e+00 : f32
    %15 = vector.broadcast %cst_11 : f32 to vector<5x128xf32>
    %16 = arith.maximumf %14, %15 : vector<5x128xf32>
    %17 = arith.truncf %16 : vector<5x128xf32> to vector<5x128xbf16>
    %c0_12 = arith.constant 0 : index
    %c0_13 = arith.constant 0 : index
    %18 = vector.load %arg6[%c0_12, %c0_13] : memref<128x100xbf16, #tpu.memory_space<vmem>>, vector<128x100xbf16>
    %cst_14 = arith.constant dense<0.000000e+00> : vector<5x100xf32>
    %19 = tpu.matmul %17, %18, %cst_14 {dimension_numbers = #tpu.dot_dimension_numbers<[1], [0], [0], [1], [0, 0, 1, 1], [], []>} : vector<5x128xbf16>, vector<128x100xbf16>, vector<5x100xf32> -> vector<5x100xf32>
    %c0_15 = arith.constant 0 : index
    %c0_16 = arith.constant 0 : index
    %20 = vector.load %arg7[%c0_15, %c0_16] : memref<1x100xf32, #tpu.memory_space<vmem>>, vector<1x100xf32>
    %21 = vector.broadcast %20 : vector<1x100xf32> to vector<5x100xf32>
    %22 = arith.addf %19, %21 : vector<5x100xf32>
    %c0_17 = arith.constant 0 : index
    %c0_18 = arith.constant 0 : index
    %23 = vector.load %arg8[%c0_17, %c0_18] : memref<5x100xf32, #tpu.memory_space<vmem>>, vector<5x100xf32>
    tpu.vector_store %arg8[%c0_17, %c0_18], %22 {strides = array<i32>} : memref<5x100xf32, #tpu.memory_space<vmem>>, vector<5x100xf32>,
    return
  }
  func.func @transform_0(%arg0: i32) -> (i32, i32) {
    %c0_i32 = arith.constant 0 : i32
    %c0_i32_0 = arith.constant 0 : i32
    return %arg0, %c0_i32 : i32, i32
  }
  func.func @transform_1(%arg0: i32) -> (i32, i32) {
    %c0_i32 = arith.constant 0 : i32
    %c0_i32_0 = arith.constant 0 : i32
    %c0_i32_1 = arith.constant 0 : i32
    return %c0_i32, %c0_i32_0 : i32, i32
  }
  func.func @transform_2(%arg0: i32) -> (i32, i32) {
    %c0_i32 = arith.constant 0 : i32
    %c0_i32_0 = arith.constant 0 : i32
    %c0_i32_1 = arith.constant 0 : i32
    return %c0_i32, %c0_i32_0 : i32, i32
  }
  func.func @transform_3(%arg0: i32) -> (i32, i32) {
    %c0_i32 = arith.constant 0 : i32
    %c0_i32_0 = arith.constant 0 : i32
    %c0_i32_1 = arith.constant 0 : i32
    return %c0_i32, %c0_i32_0 : i32, i32
  }
  func.func @transform_4(%arg0: i32) -> (i32, i32) {
    %c0_i32 = arith.constant 0 : i32
    %c0_i32_0 = arith.constant 0 : i32
    %c0_i32_1 = arith.constant 0 : i32
    return %c0_i32, %c0_i32_0 : i32, i32
  }
  func.func @transform_5(%arg0: i32) -> (i32, i32) {
    %c0_i32 = arith.constant 0 : i32
    %c0_i32_0 = arith.constant 0 : i32
    %c0_i32_1 = arith.constant 0 : i32
    return %c0_i32, %c0_i32_0 : i32, i32
  }
  func.func @transform_6(%arg0: i32) -> (i32, i32) {
    %c0_i32 = arith.constant 0 : i32
    %c0_i32_0 = arith.constant 0 : i32
    %c0_i32_1 = arith.constant 0 : i32
    return %c0_i32, %c0_i32_0 : i32, i32
  }
  func.func @transform_7(%arg0: i32) -> (i32, i32) {
    %c0_i32 = arith.constant 0 : i32
    %c0_i32_0 = arith.constant 0 : i32
    return %arg0, %c0_i32 : i32, i32
  }
}

</mosaic_0001>

<bundles_post_ra>
// kernel: decoder_forward.1
= control target key start
LH: loop header
LB: loop body
LE: loop exit
PB: predicated region body
PF: predicated region fallthrough
CT: control target
= control target key end

     0   :  { %v473_v1 = vmov 0.0   ;;  %vm474_vm0 = vmmov 0   ;;  %vm53_vm1 = vcmask 261120   ;;  %s609_s0 = inlined_call_operand.vmem [shape: f32[5,32], index: 0, kind: input, shape index: {}]   ;;  %s610_s1 = inlined_call_operand.vmem [shape: bf16[32,128], index: 1, kind: input, shape index: {}]   ;;  %s611_s2 = inlined_call_operand.vmem [shape: f32[1,128], index: 2, kind: input, shape index: {}]   ;;  %s612_s3 = inlined_call_operand.vmem [shape: bf16[128,128], index: 3, kind: input, shape index: {}]   ;;  %s613_s4 = inlined_call_operand.vmem [shape: f32[1,128], index: 4, kind: input, shape index: {}]   ;;  %s614_s5 = inlined_call_operand.vmem [shape: bf16[128,100], index: 5, kind: input, shape index: {}]   ;;  %s615_s6 = inlined_call_operand.vmem [shape: f32[1,100], index: 6, kind: input, shape index: {}]   ;;  %s616_s7 = inlined_call_operand.hbm [shape: f32[5,100], index: 7, kind: output, shape index: {}]  }
   0x1   :  { %v433_v0 = vld [vmem:[%s610_s1 + $0x8] sm:$0xff]   ;;  %382 = vmatprep.subr.bf16.mxu0 %v473_v1  ;;  %v434_v2 = vld [vmem:[%s610_s1] sm:$0xff]   ;;  %390 = vmatprep.subr.bf16.mxu1 %v473_v1  ;;  %v435_v4 = vld [vmem:[%s612_s3 + $0x38] sm:$0xff]  }
   0x2   :  { %383 = vmatpush3.bf16.msra.mxu0 %v433_v0  ;;  %386 = vmatprep.mubr.msk.bf16.mxu0 %vm474_vm0, %v473_v1  ;;  %v28_v3 = vld [vmem:[%s609_s0] sm:$0x1f]  ;;  %v436_v5 = vld [vmem:[%s612_s3 + $0x30] sm:$0xff]   ;;  %v437_v7 = vld [vmem:[%s612_s3 + $0x28] sm:$0xff]  }
   0x3   :  { %384 = vmatprep.subr.bf16.mxu0 %v473_v1  ;;  %406 = vmatprep.mubr.msk.bf16.mxu1 %vm474_vm0, %v473_v1  ;;  %v29_v6 = vpack.c.bf16 %v28_v3, %v28_v3  ;;  %v438_v8 = vld [vmem:[%s612_s3 + $0x20] sm:$0xff]  }
   0x4   :  { %391 = vmatpush3.bf16.msra.mxu1 %v435_v4 }
   0x5   :  { %392 = vmatprep.subr.bf16.mxu1 %v473_v1 }
   0x6   :  { %385 = vmatpush3.bf16.msra.mxu0 %v434_v2 }
   0x7   :  { %410 = vmatprep.subr.bf16.mxu0 %v473_v1 }
   0x8   :  { %393 = vmatpush3.bf16.msra.mxu1 %v436_v5 }
   0x9   :  { %387 = vmatmul.mubr.msk.bf16.vlgmr.msra.gmra.mxu0 %vm53_vm1, %v29_v6  ;;  %394 = vmatprep.subr.bf16.mxu1 %v473_v1 }
   0xa   :  { %426 = vmatprep.mubr.msk.bf16.mxu0 %vm474_vm0, %v473_v1 }
   0xc   :  { %395 = vmatpush3.bf16.msra.mxu1 %v437_v7 }
   0xd   :  { %396 = vmatprep.subr.bf16.mxu1 %v473_v1 }
   0xe   :  { %12 = vsyncpa [#allocation3], 0  ;;  %v439_v9 = vld [vmem:[%s612_s3 + $0x18] sm:$0xff]   ;;  %v440_v10 = vld [vmem:[%s612_s3 + $0x10] sm:$0xff]   ;;  %s475_s16 = smov [#allocation2]   ;;  %vm323_vm2 = vcmask 815104  }
   0xf   :  { %v441_v11 = vld [vmem:[%s612_s3 + $0x8] sm:$0xff]   ;;  %v442_v12 = vld [vmem:[%s612_s3] sm:$0xff]   ;;  %v443_v13 = vld [vmem:[%s614_s5 + $0x38] sm:$0xff]   ;;  %s331_s17 = sshll.u32 %s475_s16, 4  ;;  %s332_s17 = int_to_ptr.vmem [resolvable:$true] %s331_s17 }
  0x10   :  { %397 = vmatpush3.bf16.msra.mxu1 %v438_v8  ;;  %411 = vmatpush3.bf16.msra.mxu0 %v443_v13  ;;  %v444_v14 = vld [vmem:[%s614_s5 + $0x30] sm:$0xff]   ;;  %v445_v15 = vld [vmem:[%s614_s5 + $0x28] sm:$0xff]   ;;  %v446_v16 = vld [vmem:[%s614_s5 + $0x20] sm:$0xff]   ;;  %p456_p1 = scmp.lt.s32.totalorder %s332_s17, %s332_s17 }
  0x11   :  { %398 = vmatprep.subr.bf16.mxu1 %v473_v1  ;;  %412 = vmatprep.subr.bf16.mxu0 %v473_v1  ;;  %v447_v17 = vld [vmem:[%s614_s5 + $0x18] sm:$0xff]   ;;  %v448_v18 = vld [vmem:[%s614_s5 + $0x10] sm:$0xff]   ;;  %v339_v19 = vld [vmem:[%s611_s2] ss:$0 sm:$0xff] }
  0x12   :  { %v449_v27 = vld [vmem:[%s614_s5 + $0x8] sm:$0xff]   ;;  %v450_v28 = vld [vmem:[%s614_s5] sm:$0xff]  }
  0x13   :  { %v343_v29 = vld [vmem:[%s613_s4] ss:$0 sm:$0xff]  ;;  %s451_s4 = scalar_lea.vmem %s332_s17, 128 }
  0x14   :  { %399 = vmatpush3.bf16.msra.mxu1 %v439_v9  ;;  %413 = vmatpush3.bf16.msra.mxu0 %v444_v14  ;;  %v352_v37 = vld [vmem:[%s615_s6] ss:$0 sm:$0xff]  ;;  %p452_p0 = scmp.ne.s32.totalorder %s332_s17, %s451_s4  ;;  %p457_p2 = scmp.lt.s32.totalorder %s451_s4, %s451_s4 }
  0x15   :  { %400 = vmatprep.subr.bf16.mxu1 %v473_v1  ;;  %414 = vmatprep.subr.bf16.mxu0 %v473_v1 }
  0x16   :  { %p458_p3 = por %p457_p2, %p456_p1 }
  0x18   :  { %401 = vmatpush3.bf16.msra.mxu1 %v440_v10  ;;  %415 = vmatpush3.bf16.msra.mxu0 %v445_v15  ;;  %p459_p4 = pnand %p458_p3, %p452_p0 }
  0x19   :  { %402 = vmatprep.subr.bf16.mxu1 %v473_v1  ;;  %416 = vmatprep.subr.bf16.mxu0 %v473_v1 }
  0x1c   :  { %403 = vmatpush3.bf16.msra.mxu1 %v441_v11  ;;  %417 = vmatpush3.bf16.msra.mxu0 %v446_v16 }
  0x1d   :  { %404 = vmatprep.subr.bf16.mxu1 %v473_v1  ;;  %418 = vmatprep.subr.bf16.mxu0 %v473_v1 }
  0x20   :  { %405 = vmatpush3.bf16.msra.mxu1 %v442_v12  ;;  %419 = vmatpush3.bf16.msra.mxu0 %v447_v17 }
  0x21   :  { %420 = vmatprep.subr.bf16.mxu0 %v473_v1 }
  0x24   :  { %421 = vmatpush3.bf16.msra.mxu0 %v448_v18 }
  0x25   :  { %422 = vmatprep.subr.bf16.mxu0 %v473_v1 }
  0x28   :  { %423 = vmatpush3.bf16.msra.mxu0 %v449_v27 }
  0x29   :  { %424 = vmatprep.subr.bf16.mxu0 %v473_v1 }
  0x2c   :  { %425 = vmatpush3.bf16.msra.mxu0 %v450_v28 }
  0xc9   :  { %v91_v20 = vpop.f32.mrf.mxu0 }
  0xca   :  { %v92_v21 = vadd.f32 %v339_v19, %v91_v20 }
  0xcb   :  { %v388_v22 = vpop.f32.mrf.mxu0 }
  0xcc   :  { %v97_v23 = vmax.f32 %v92_v21, 0.0 }
  0xcd   :  { %v94_v24 = vpop.f32.mrf.mxu0 }
  0xce   :  { %v98_v25 = vpack.c.bf16 %v97_v23, %v97_v23 }
  0xcf   :  { %v389_v26 = vpop.f32.mrf.mxu0 }
  0xd0   :  { %407 = vmatmul.mubr.bf16.vlgmr.msra.gmra.mxu1 %v98_v25 }
 0x190   :  { %v204_v30 = vpop.f32.mrf.mxu1 }
 0x191   :  { %v205_v31 = vadd.f32 %v343_v29, %v204_v30 }
 0x192   :  { %v408_v32 = vpop.f32.mrf.mxu1 }
 0x193   :  { %v210_v33 = vmax.f32 %v205_v31, 0.0 }
 0x194   :  { %v207_v34 = vpop.f32.mrf.mxu1 }
 0x195   :  { %v211_v35 = vpack.c.bf16 %v210_v33, %v210_v33 }
 0x196   :  { %v409_v36 = vpop.f32.mrf.mxu1 }
 0x197   :  { %427 = vmatmul.mubr.bf16.vlgmr.msra.gmra.mxu0 %v211_v35 }
 0x257   :  { %v317_v38 = vpop.f32.mrf.mxu0 }
 0x258   :  { %v318_v39 = vadd.f32 %v352_v37, %v317_v38 }
 0x259   :  { %v428_v40 = vpop.f32.mrf.mxu0 }
 0x25a   :  { %324 = vst.msk [vmem:[#allocation2] sm:$0x1f] %vm323_vm2, %v318_v39 }
 0x25b   :  { %v320_v41 = vpop.f32.mrf.mxu0 }
 0x25c   :  { %462 = shalt.err (!%p459_p4)
}
 0x25d   :  { %334 = dma.vmem_to_hbm [thread:$0]  %s332_s17, 128, %s616_s7, [#allocation3]   ;;  %v429_v42 = vpop.f32.mrf.mxu0 }
 0x25e   :  { %471 = dma.done.wait [#allocation3], 128  }
 0x25f   :  { %472 = vsyncadd [#allocation3], 4294967168 }
 0x260   :  { %338 = vsyncpa [#allocation3], 1 }

</bundles_post_ra>
